<compile_context>
chip_gen: v7x
topology: tpu7x:2x2x1
jax: 0.10.0
libtpu: 0.0.40
codegen_flags: <defaults>
</compile_context>

<pallas_src>
from functools import partial

import jax
import jax.numpy as jnp
from jax import lax
from jax.experimental import pallas as pl
from jax.experimental.pallas import tpu as pltpu


def _lstm_tagger_kernel(idx_ref, table_ref, bias_ref, whh_ref, wtag_ref,
                        btag_ref, out_ref, *, seq_len, block_b, hidden):
    """One block of BB sentences: gather+proj, LSTM recurrence, tag head.

    idx_ref:   (T*BB, 1)  int32   token ids, t-major (row = t*BB + b)
    table_ref: (V, 4H)    f32     precomputed emb @ W_ih (gate order i,f,g,o)
    bias_ref:  (1, 4H)    f32     b_ih + b_hh
    whh_ref:   (H, 4H)    f32     fused hidden->gates weights
    wtag_ref:  (H, Kp)    f32     hidden2tag weight, lane-padded to Kp=128
    btag_ref:  (1, Kp)    f32     hidden2tag bias, pad lanes = -1e30
    out_ref:   (T*BB, Kp) f32     log_softmax(tag_space), t-major rows
    """
    T, BB, H = seq_len, block_b, hidden
    V = table_ref.shape[0]
    G4 = whh_ref.shape[1]                                        # 4H

    # ---- Fused embedding gather + input projection (one MXU matmul). ----
    idx = idx_ref[...]                                           # (T*BB, 1)
    iota_v = lax.broadcasted_iota(jnp.int32, (T * BB, V), 1)
    onehot = (iota_v == idx).astype(jnp.float32)                 # (T*BB, V)
    xg = jnp.dot(onehot, table_ref[...],
                 preferred_element_type=jnp.float32) + bias_ref[...]  # (T*BB, 4H)

    whh = whh_ref[...]                                           # (H, 4H)

    # ---- Hoisted activation-fusion constants (built once, not per step). ----
    # sigmoid(x) = 0.5 * (1 + tanh(x/2)) for the i/f/o lanes; plain tanh on g.
    lane = lax.broadcasted_iota(jnp.int32, (BB, G4), 1)
    g_mask = (lane >= 2 * H) & (lane < 3 * H)                    # g-gate lanes
    pre_scale = jnp.where(g_mask, jnp.float32(1.0), jnp.float32(0.5))

    # ---- Fully unrolled recurrence over T (small & static). ----
    h = jnp.zeros((BB, H), jnp.float32)
    c = jnp.zeros((BB, H), jnp.float32)
    h_rows = []
    for t in range(T):
        gates = xg[t * BB:(t + 1) * BB, :] + jnp.dot(
            h, whh, preferred_element_type=jnp.float32)          # (BB, 4H)
        tg = jnp.tanh(gates * pre_scale)                         # single EUP pass
        act = jnp.where(g_mask, tg, 0.5 * tg + 0.5)              # sig(i,f,o)/tanh(g)
        i_g = act[:, 0 * H:1 * H]
        f_g = act[:, 1 * H:2 * H]
        g_g = act[:, 2 * H:3 * H]
        o_g = act[:, 3 * H:4 * H]
        c = f_g * c + i_g * g_g
        h = o_g * jnp.tanh(c)
        h_rows.append(h)

    hs = jnp.concatenate(h_rows, axis=0)                         # (T*BB, H)

    # ---- hidden2tag (lane-padded) + log_softmax over the tag axis. ----
    tag_space = jnp.dot(hs, wtag_ref[...],
                        preferred_element_type=jnp.float32) + btag_ref[...]  # (T*BB, Kp)
    m = jnp.max(tag_space, axis=1, keepdims=True)
    lse = m + jnp.log(jnp.sum(jnp.exp(tag_space - m), axis=1, keepdims=True))
    out_ref[...] = tag_space - lse                               # full-tile store


def lstm_tagger_forward(sentences, params, *, block_b=8):
    """Forward pass. `sentences` is (T,) for the original single-sentence
    module contract, or (B, T) for a batch of independent sentences."""
    single = sentences.ndim == 1
    if single:
        sentences = sentences[None, :]
    B, T = sentences.shape

    emb = params["embedding"].astype(jnp.float32)                # (V, E)
    wih = params["w_ih"]                                         # (E, 4H)
    whh = params["w_hh"]                                         # (H, 4H)
    bias = params["bias"]                                        # (1, 4H)
    wtag = params["w_tag"]                                       # (H, K)
    btag = params["b_tag"]                                       # (1, K)

    V = emb.shape[0]
    H = whh.shape[0]
    G4 = whh.shape[1]
    K = wtag.shape[1]
    Kp = ((K + 127) // 128) * 128                                # lane-dense output

    # Fold the embedding into the input projection (exact row-select commute).
    table = jnp.dot(emb, wih)                                    # (V, 4H)

    # Pad the tagger head: zero weight cols, -1e30 bias in pad lanes so
    # log_softmax over Kp lanes equals log_softmax over the real K lanes.
    wtag_p = jnp.zeros((H, Kp), jnp.float32).at[:, :K].set(wtag)
    btag_p = jnp.full((1, Kp), -1e30, jnp.float32).at[:, :K].set(btag)

    # Batch padding + t-major flattening: block i, row t*BB + b  <->
    # sentence i*BB + b, timestep t.
    BB = block_b
    Bp = ((B + BB - 1) // BB) * BB
    nb = Bp // BB
    sent_p = jnp.zeros((Bp, T), jnp.int32).at[:B, :].set(sentences.astype(jnp.int32))
    idx = sent_p.reshape(nb, BB, T).transpose(0, 2, 1).reshape(nb * T * BB, 1)

    kernel = partial(_lstm_tagger_kernel, seq_len=T, block_b=BB, hidden=H)

    out_p = pl.pallas_call(
        kernel,
        out_shape=jax.ShapeDtypeStruct((nb * T * BB, Kp), jnp.float32),
        grid=(nb,),
        in_specs=[
            pl.BlockSpec((T * BB, 1), lambda i: (i, 0)),   # idx   (blocked on batch)
            pl.BlockSpec((V, G4), lambda i: (0, 0)),       # table (resident)
            pl.BlockSpec((1, G4), lambda i: (0, 0)),       # bias  (resident)
            pl.BlockSpec((H, G4), lambda i: (0, 0)),       # w_hh  (resident)
            pl.BlockSpec((H, Kp), lambda i: (0, 0)),       # w_tag (resident)
            pl.BlockSpec((1, Kp), lambda i: (0, 0)),       # b_tag (resident)
        ],
        out_specs=pl.BlockSpec((T * BB, Kp), lambda i: (i, 0)),
        compiler_params=pltpu.CompilerParams(
            dimension_semantics=("parallel",)),            # 2nd TC on v7x
    )(idx, table, bias, whh, wtag_p, btag_p)

    out = (out_p.reshape(nb, T, BB, Kp)
           .transpose(0, 2, 1, 3)
           .reshape(Bp, T, Kp)[:B, :, :K])                       # (B, T, K)
    return out[0] if single else out


def make_params(key, vocab_size, embedding_dim, hidden_dim, tagset_size):
    """Deterministic synthetic parameters, PyTorch-equivalent shapes,
    repacked into the fused lane-dense kernel layout (gate order i,f,g,o)."""
    ks = jax.random.split(key, 7)
    E, H, V, K = embedding_dim, hidden_dim, vocab_size, tagset_size
    s = 1.0 / jnp.sqrt(H)
    emb = jax.random.normal(ks[0], (V, E), jnp.float32)
    # nn.LSTM weights: weight_ih (4H, E), weight_hh (4H, H), gate order i,f,g,o.
    w_ih = jax.random.uniform(ks[1], (4 * H, E), jnp.float32, -s, s)
    w_hh = jax.random.uniform(ks[2], (4 * H, H), jnp.float32, -s, s)
    b_ih = jax.random.uniform(ks[3], (4 * H,), jnp.float32, -s, s)
    b_hh = jax.random.uniform(ks[4], (4 * H,), jnp.float32, -s, s)
    # nn.Linear(H, K): weight (K, H), bias (K,)
    w_tag = jax.random.uniform(ks[5], (K, H), jnp.float32, -s, s)
    b_tag = jax.random.uniform(ks[6], (K,), jnp.float32, -s, s)

    return {
        "embedding": emb,                            # (V, E)
        "w_ih": w_ih.T,                              # (E, 4H)  fused x->gates
        "w_hh": w_hh.T,                              # (H, 4H)  fused h->gates
        "bias": (b_ih + b_hh).reshape(1, 4 * H),     # (1, 4H)
        "w_tag": w_tag.T,                            # (H, K)
        "b_tag": b_tag.reshape(1, K),                # (1, K)
    }


def reference_forward(sentence_in, params):
    """Pure-JAX reference matching PyTorch LSTMTagger.forward semantics
    (single sentence, batch=1 LSTM)."""
    embeds = jnp.take(params["embedding"], sentence_in, axis=0)   # (T, E)
    H = params["w_hh"].shape[0]
    wih, whh, b = params["w_ih"], params["w_hh"], params["bias"]

    def step(carry, x):
        h, c = carry
        gates = x[None, :] @ wih + h @ whh + b                    # (1, 4H)
        i = jax.nn.sigmoid(gates[:, 0:H])
        f = jax.nn.sigmoid(gates[:, H:2 * H])
        g = jnp.tanh(gates[:, 2 * H:3 * H])
        o = jax.nn.sigmoid(gates[:, 3 * H:4 * H])
        c = f * c + i * g
        h = o * jnp.tanh(c)
        return (h, c), h[0]

    h0 = jnp.zeros((1, H), jnp.float32)
    c0 = jnp.zeros((1, H), jnp.float32)
    _, hs = lax.scan(step, (h0, c0), embeds)                      # (T, H)
    tag_space = hs @ params["w_tag"] + params["b_tag"]            # (T, K)
    return jax.nn.log_softmax(tag_space, axis=1)


if __name__ == "__main__":
    EMBEDDING_DIM = 32
    HIDDEN_DIM = 32
    VOCAB_SIZE = 16
    TAGSET_SIZE = 8
    SEQ_LEN = 8
    BATCH = 16            # 2 blocks of 8 sentences -> exercises the parallel grid

    key = jax.random.PRNGKey(0)
    pkey, skey = jax.random.split(key)
    params = make_params(pkey, VOCAB_SIZE, EMBEDDING_DIM, HIDDEN_DIM, TAGSET_SIZE)
    sentences = jax.random.randint(skey, (BATCH, SEQ_LEN), 0, VOCAB_SIZE,
                                   dtype=jnp.int32)

    # Batched path (sentences fill the MXU sublane dim + parallel grid axis).
    out = jax.block_until_ready(lstm_tagger_forward(sentences, params))
    ref = jax.block_until_ready(
        jax.vmap(reference_forward, in_axes=(0, None))(sentences, params))
    assert out.shape == (BATCH, SEQ_LEN, TAGSET_SIZE)
    assert jnp.allclose(out, ref, atol=1e-4, rtol=1e-4), (
        f"batched max abs err {jnp.max(jnp.abs(out - ref))}")

    # Original single-sentence module contract.
    out1 = jax.block_until_ready(lstm_tagger_forward(sentences[0], params))
    ref1 = jax.block_until_ready(reference_forward(sentences[0], params))
    assert out1.shape == (SEQ_LEN, TAGSET_SIZE)
    assert jnp.allclose(out1, ref1, atol=1e-4, rtol=1e-4), (
        f"single max abs err {jnp.max(jnp.abs(out1 - ref1))}")

    print("KERNEL_OK")
</pallas_src>

<mosaic_0001>
module attributes {stable_mosaic.version = 11 : i64} {
  func.func @_lstm_tagger_kernel(%arg0: i32, %arg1: memref<64x1xi32, #tpu.memory_space<vmem>>, %arg2: memref<16x128xf32, #tpu.memory_space<vmem>>, %arg3: memref<1x128xf32, #tpu.memory_space<vmem>>, %arg4: memref<32x128xf32, #tpu.memory_space<vmem>>, %arg5: memref<32x128xf32, #tpu.memory_space<vmem>>, %arg6: memref<1x128xf32, #tpu.memory_space<vmem>>, %arg7: memref<64x128xf32, #tpu.memory_space<vmem>>) attributes {dimension_semantics = [#tpu.dimension_semantics<parallel>], iteration_bounds = array<i64: 2>, scalar_prefetch = 0 : i64, scratch_operands = 0 : i64, tpu.core_type = #tpu.core_type<tc>, window_params = [{transform_indices = @transform_0, window_bounds = array<i64: 64, 1>}, {pipeline_mode = #tpu.pipeline_mode<synchronous>, transform_indices = @transform_1, window_bounds = array<i64: 16, 128>}, {pipeline_mode = #tpu.pipeline_mode<synchronous>, transform_indices = @transform_2, window_bounds = array<i64: 1, 128>}, {pipeline_mode = #tpu.pipeline_mode<synchronous>, transform_indices = @transform_3, window_bounds = array<i64: 32, 128>}, {pipeline_mode = #tpu.pipeline_mode<synchronous>, transform_indices = @transform_4, window_bounds = array<i64: 32, 128>}, {pipeline_mode = #tpu.pipeline_mode<synchronous>, transform_indices = @transform_5, window_bounds = array<i64: 1, 128>}, {transform_indices = @transform_6, window_bounds = array<i64: 64, 128>}]} {
    %c0 = arith.constant 0 : index
    %c0_0 = arith.constant 0 : index
    %0 = vector.load %arg1[%c0, %c0_0] : memref<64x1xi32, #tpu.memory_space<vmem>>, vector<64x1xi32>
    %1 = tpu.iota {dimensions = array<i32: 1>} : vector<64x16xi32>
    %2 = vector.broadcast %0 : vector<64x1xi32> to vector<64x16xi32>
    %3 = arith.cmpi eq, %1, %2 : vector<64x16xi32>
    %4 = arith.extui %3 : vector<64x16xi1> to vector<64x16xi32>
    %5 = arith.sitofp %4 : vector<64x16xi32> to vector<64x16xf32>
    %c0_1 = arith.constant 0 : index
    %c0_2 = arith.constant 0 : index
    %6 = vector.load %arg2[%c0_1, %c0_2] : memref<16x128xf32, #tpu.memory_space<vmem>>, vector<16x128xf32>
    %cst = arith.constant dense<0.000000e+00> : vector<64x128xf32>
    %7 = tpu.matmul %5, %6, %cst {dimension_numbers = #tpu.dot_dimension_numbers<[1], [0], [0], [1], [0, 0, 1, 1], [], []>} : vector<64x16xf32>, vector<16x128xf32>, vector<64x128xf32> -> vector<64x128xf32>
    %c0_3 = arith.constant 0 : index
    %c0_4 = arith.constant 0 : index
    %8 = vector.load %arg3[%c0_3, %c0_4] : memref<1x128xf32, #tpu.memory_space<vmem>>, vector<1x128xf32>
    %9 = vector.broadcast %8 : vector<1x128xf32> to vector<64x128xf32>
    %10 = arith.addf %7, %9 : vector<64x128xf32>
    %c0_5 = arith.constant 0 : index
    %c0_6 = arith.constant 0 : index
    %11 = vector.load %arg4[%c0_5, %c0_6] : memref<32x128xf32, #tpu.memory_space<vmem>>, vector<32x128xf32>
    %12 = tpu.iota {dimensions = array<i32: 1>} : vector<8x128xi32>
    %c64_i32 = arith.constant 64 : i32
    %13 = vector.broadcast %c64_i32 : i32 to vector<8x128xi32>
    %14 = arith.cmpi sge, %12, %13 : vector<8x128xi32>
    %c96_i32 = arith.constant 96 : i32
    %15 = vector.broadcast %c96_i32 : i32 to vector<8x128xi32>
    %16 = arith.cmpi slt, %12, %15 : vector<8x128xi32>
    %17 = arith.andi %14, %16 : vector<8x128xi1>
    %cst_7 = arith.constant 1.000000e+00 : f32
    %cst_8 = arith.constant 5.000000e-01 : f32
    %18 = vector.broadcast %cst_7 : f32 to vector<8x128xf32>
    %19 = vector.broadcast %cst_8 : f32 to vector<8x128xf32>
    %20 = arith.select %17, %18, %19 : vector<8x128xi1>, vector<8x128xf32>
    %cst_9 = arith.constant 0.000000e+00 : f32
    %21 = vector.broadcast %cst_9 : f32 to vector<8x32xf32>
    %cst_10 = arith.constant 0.000000e+00 : f32
    %22 = vector.broadcast %cst_10 : f32 to vector<8x32xf32>
    %23 = vector.extract_strided_slice %10 {offsets = [0, 0], sizes = [8, 128], strides = [1, 1]} : vector<64x128xf32> to vector<8x128xf32>
    %cst_11 = arith.constant dense<0.000000e+00> : vector<8x128xf32>
    %24 = tpu.matmul %21, %11, %cst_11 {dimension_numbers = #tpu.dot_dimension_numbers<[1], [0], [0], [1], [0, 0, 1, 1], [], []>} : vector<8x32xf32>, vector<32x128xf32>, vector<8x128xf32> -> vector<8x128xf32>
    %25 = arith.addf %23, %24 : vector<8x128xf32>
    %26 = arith.mulf %25, %20 : vector<8x128xf32>
    %27 = math.tanh %26 : vector<8x128xf32>
    %cst_12 = arith.constant 5.000000e-01 : f32
    %28 = vector.broadcast %cst_12 : f32 to vector<8x128xf32>
    %29 = arith.mulf %28, %27 : vector<8x128xf32>
    %cst_13 = arith.constant 5.000000e-01 : f32
    %30 = vector.broadcast %cst_13 : f32 to vector<8x128xf32>
    %31 = arith.addf %29, %30 : vector<8x128xf32>
    %32 = arith.select %17, %27, %31 : vector<8x128xi1>, vector<8x128xf32>
    %33 = vector.extract_strided_slice %32 {offsets = [0, 0], sizes = [8, 32], strides = [1, 1]} : vector<8x128xf32> to vector<8x32xf32>
    %34 = vector.extract_strided_slice %32 {offsets = [0, 32], sizes = [8, 32], strides = [1, 1]} : vector<8x128xf32> to vector<8x32xf32>
    %35 = vector.extract_strided_slice %32 {offsets = [0, 64], sizes = [8, 32], strides = [1, 1]} : vector<8x128xf32> to vector<8x32xf32>
    %36 = vector.extract_strided_slice %32 {offsets = [0, 96], sizes = [8, 32], strides = [1, 1]} : vector<8x128xf32> to vector<8x32xf32>
    %37 = arith.mulf %34, %22 : vector<8x32xf32>
    %38 = arith.mulf %33, %35 : vector<8x32xf32>
    %39 = arith.addf %37, %38 : vector<8x32xf32>
    %40 = math.tanh %39 : vector<8x32xf32>
    %41 = arith.mulf %36, %40 : vector<8x32xf32>
    %42 = vector.extract_strided_slice %10 {offsets = [8, 0], sizes = [8, 128], strides = [1, 1]} : vector<64x128xf32> to vector<8x128xf32>
    %cst_14 = arith.constant dense<0.000000e+00> : vector<8x128xf32>
    %43 = tpu.matmul %41, %11, %cst_14 {dimension_numbers = #tpu.dot_dimension_numbers<[1], [0], [0], [1], [0, 0, 1, 1], [], []>} : vector<8x32xf32>, vector<32x128xf32>, vector<8x128xf32> -> vector<8x128xf32>
    %44 = arith.addf %42, %43 : vector<8x128xf32>
    %45 = arith.mulf %44, %20 : vector<8x128xf32>
    %46 = math.tanh %45 : vector<8x128xf32>
    %cst_15 = arith.constant 5.000000e-01 : f32
    %47 = vector.broadcast %cst_15 : f32 to vector<8x128xf32>
    %48 = arith.mulf %47, %46 : vector<8x128xf32>
    %cst_16 = arith.constant 5.000000e-01 : f32
    %49 = vector.broadcast %cst_16 : f32 to vector<8x128xf32>
    %50 = arith.addf %48, %49 : vector<8x128xf32>
    %51 = arith.select %17, %46, %50 : vector<8x128xi1>, vector<8x128xf32>
    %52 = vector.extract_strided_slice %51 {offsets = [0, 0], sizes = [8, 32], strides = [1, 1]} : vector<8x128xf32> to vector<8x32xf32>
    %53 = vector.extract_strided_slice %51 {offsets = [0, 32], sizes = [8, 32], strides = [1, 1]} : vector<8x128xf32> to vector<8x32xf32>
    %54 = vector.extract_strided_slice %51 {offsets = [0, 64], sizes = [8, 32], strides = [1, 1]} : vector<8x128xf32> to vector<8x32xf32>
    %55 = vector.extract_strided_slice %51 {offsets = [0, 96], sizes = [8, 32], strides = [1, 1]} : vector<8x128xf32> to vector<8x32xf32>
    %56 = arith.mulf %53, %39 : vector<8x32xf32>
    %57 = arith.mulf %52, %54 : vector<8x32xf32>
    %58 = arith.addf %56, %57 : vector<8x32xf32>
    %59 = math.tanh %58 : vector<8x32xf32>
    %60 = arith.mulf %55, %59 : vector<8x32xf32>
    %61 = vector.extract_strided_slice %10 {offsets = [16, 0], sizes = [8, 128], strides = [1, 1]} : vector<64x128xf32> to vector<8x128xf32>
    %cst_17 = arith.constant dense<0.000000e+00> : vector<8x128xf32>
    %62 = tpu.matmul %60, %11, %cst_17 {dimension_numbers = #tpu.dot_dimension_numbers<[1], [0], [0], [1], [0, 0, 1, 1], [], []>} : vector<8x32xf32>, vector<32x128xf32>, vector<8x128xf32> -> vector<8x128xf32>
    %63 = arith.addf %61, %62 : vector<8x128xf32>
    %64 = arith.mulf %63, %20 : vector<8x128xf32>
    %65 = math.tanh %64 : vector<8x128xf32>
    %cst_18 = arith.constant 5.000000e-01 : f32
    %66 = vector.broadcast %cst_18 : f32 to vector<8x128xf32>
    %67 = arith.mulf %66, %65 : vector<8x128xf32>
    %cst_19 = arith.constant 5.000000e-01 : f32
    %68 = vector.broadcast %cst_19 : f32 to vector<8x128xf32>
    %69 = arith.addf %67, %68 : vector<8x128xf32>
    %70 = arith.select %17, %65, %69 : vector<8x128xi1>, vector<8x128xf32>
    %71 = vector.extract_strided_slice %70 {offsets = [0, 0], sizes = [8, 32], strides = [1, 1]} : vector<8x128xf32> to vector<8x32xf32>
    %72 = vector.extract_strided_slice %70 {offsets = [0, 32], sizes = [8, 32], strides = [1, 1]} : vector<8x128xf32> to vector<8x32xf32>
    %73 = vector.extract_strided_slice %70 {offsets = [0, 64], sizes = [8, 32], strides = [1, 1]} : vector<8x128xf32> to vector<8x32xf32>
    %74 = vector.extract_strided_slice %70 {offsets = [0, 96], sizes = [8, 32], strides = [1, 1]} : vector<8x128xf32> to vector<8x32xf32>
    %75 = arith.mulf %72, %58 : vector<8x32xf32>
    %76 = arith.mulf %71, %73 : vector<8x32xf32>
    %77 = arith.addf %75, %76 : vector<8x32xf32>
    %78 = math.tanh %77 : vector<8x32xf32>
    %79 = arith.mulf %74, %78 : vector<8x32xf32>
    %80 = vector.extract_strided_slice %10 {offsets = [24, 0], sizes = [8, 128], strides = [1, 1]} : vector<64x128xf32> to vector<8x128xf32>
    %cst_20 = arith.constant dense<0.000000e+00> : vector<8x128xf32>
    %81 = tpu.matmul %79, %11, %cst_20 {dimension_numbers = #tpu.dot_dimension_numbers<[1], [0], [0], [1], [0, 0, 1, 1], [], []>} : vector<8x32xf32>, vector<32x128xf32>, vector<8x128xf32> -> vector<8x128xf32>
    %82 = arith.addf %80, %81 : vector<8x128xf32>
    %83 = arith.mulf %82, %20 : vector<8x128xf32>
    %84 = math.tanh %83 : vector<8x128xf32>
    %cst_21 = arith.constant 5.000000e-01 : f32
    %85 = vector.broadcast %cst_21 : f32 to vector<8x128xf32>
    %86 = arith.mulf %85, %84 : vector<8x128xf32>
    %cst_22 = arith.constant 5.000000e-01 : f32
    %87 = vector.broadcast %cst_22 : f32 to vector<8x128xf32>
    %88 = arith.addf %86, %87 : vector<8x128xf32>
    %89 = arith.select %17, %84, %88 : vector<8x128xi1>, vector<8x128xf32>
    %90 = vector.extract_strided_slice %89 {offsets = [0, 0], sizes = [8, 32], strides = [1, 1]} : vector<8x128xf32> to vector<8x32xf32>
    %91 = vector.extract_strided_slice %89 {offsets = [0, 32], sizes = [8, 32], strides = [1, 1]} : vector<8x128xf32> to vector<8x32xf32>
    %92 = vector.extract_strided_slice %89 {offsets = [0, 64], sizes = [8, 32], strides = [1, 1]} : vector<8x128xf32> to vector<8x32xf32>
    %93 = vector.extract_strided_slice %89 {offsets = [0, 96], sizes = [8, 32], strides = [1, 1]} : vector<8x128xf32> to vector<8x32xf32>
    %94 = arith.mulf %91, %77 : vector<8x32xf32>
    %95 = arith.mulf %90, %92 : vector<8x32xf32>
    %96 = arith.addf %94, %95 : vector<8x32xf32>
    %97 = math.tanh %96 : vector<8x32xf32>
    %98 = arith.mulf %93, %97 : vector<8x32xf32>
    %99 = vector.extract_strided_slice %10 {offsets = [32, 0], sizes = [8, 128], strides = [1, 1]} : vector<64x128xf32> to vector<8x128xf32>
    %cst_23 = arith.constant dense<0.000000e+00> : vector<8x128xf32>
    %100 = tpu.matmul %98, %11, %cst_23 {dimension_numbers = #tpu.dot_dimension_numbers<[1], [0], [0], [1], [0, 0, 1, 1], [], []>} : vector<8x32xf32>, vector<32x128xf32>, vector<8x128xf32> -> vector<8x128xf32>
    %101 = arith.addf %99, %100 : vector<8x128xf32>
    %102 = arith.mulf %101, %20 : vector<8x128xf32>
    %103 = math.tanh %102 : vector<8x128xf32>
    %cst_24 = arith.constant 5.000000e-01 : f32
    %104 = vector.broadcast %cst_24 : f32 to vector<8x128xf32>
    %105 = arith.mulf %104, %103 : vector<8x128xf32>
    %cst_25 = arith.constant 5.000000e-01 : f32
    %106 = vector.broadcast %cst_25 : f32 to vector<8x128xf32>
    %107 = arith.addf %105, %106 : vector<8x128xf32>
    %108 = arith.select %17, %103, %107 : vector<8x128xi1>, vector<8x128xf32>
    %109 = vector.extract_strided_slice %108 {offsets = [0, 0], sizes = [8, 32], strides = [1, 1]} : vector<8x128xf32> to vector<8x32xf32>
    %110 = vector.extract_strided_slice %108 {offsets = [0, 32], sizes = [8, 32], strides = [1, 1]} : vector<8x128xf32> to vector<8x32xf32>
    %111 = vector.extract_strided_slice %108 {offsets = [0, 64], sizes = [8, 32], strides = [1, 1]} : vector<8x128xf32> to vector<8x32xf32>
    %112 = vector.extract_strided_slice %108 {offsets = [0, 96], sizes = [8, 32], strides = [1, 1]} : vector<8x128xf32> to vector<8x32xf32>
    %113 = arith.mulf %110, %96 : vector<8x32xf32>
    %114 = arith.mulf %109, %111 : vector<8x32xf32>
    %115 = arith.addf %113, %114 : vector<8x32xf32>
    %116 = math.tanh %115 : vector<8x32xf32>
    %117 = arith.mulf %112, %116 : vector<8x32xf32>
    %118 = vector.extract_strided_slice %10 {offsets = [40, 0], sizes = [8, 128], strides = [1, 1]} : vector<64x128xf32> to vector<8x128xf32>
    %cst_26 = arith.constant dense<0.000000e+00> : vector<8x128xf32>
    %119 = tpu.matmul %117, %11, %cst_26 {dimension_numbers = #tpu.dot_dimension_numbers<[1], [0], [0], [1], [0, 0, 1, 1], [], []>} : vector<8x32xf32>, vector<32x128xf32>, vector<8x128xf32> -> vector<8x128xf32>
    %120 = arith.addf %118, %119 : vector<8x128xf32>
    %121 = arith.mulf %120, %20 : vector<8x128xf32>
    %122 = math.tanh %121 : vector<8x128xf32>
    %cst_27 = arith.constant 5.000000e-01 : f32
    %123 = vector.broadcast %cst_27 : f32 to vector<8x128xf32>
    %124 = arith.mulf %123, %122 : vector<8x128xf32>
    %cst_28 = arith.constant 5.000000e-01 : f32
    %125 = vector.broadcast %cst_28 : f32 to vector<8x128xf32>
    %126 = arith.addf %124, %125 : vector<8x128xf32>
    %127 = arith.select %17, %122, %126 : vector<8x128xi1>, vector<8x128xf32>
    %128 = vector.extract_strided_slice %127 {offsets = [0, 0], sizes = [8, 32], strides = [1, 1]} : vector<8x128xf32> to vector<8x32xf32>
    %129 = vector.extract_strided_slice %127 {offsets = [0, 32], sizes = [8, 32], strides = [1, 1]} : vector<8x128xf32> to vector<8x32xf32>
    %130 = vector.extract_strided_slice %127 {offsets = [0, 64], sizes = [8, 32], strides = [1, 1]} : vector<8x128xf32> to vector<8x32xf32>
    %131 = vector.extract_strided_slice %127 {offsets = [0, 96], sizes = [8, 32], strides = [1, 1]} : vector<8x128xf32> to vector<8x32xf32>
    %132 = arith.mulf %129, %115 : vector<8x32xf32>
    %133 = arith.mulf %128, %130 : vector<8x32xf32>
    %134 = arith.addf %132, %133 : vector<8x32xf32>
    %135 = math.tanh %134 : vector<8x32xf32>
    %136 = arith.mulf %131, %135 : vector<8x32xf32>
    %137 = vector.extract_strided_slice %10 {offsets = [48, 0], sizes = [8, 128], strides = [1, 1]} : vector<64x128xf32> to vector<8x128xf32>
    %cst_29 = arith.constant dense<0.000000e+00> : vector<8x128xf32>
    %138 = tpu.matmul %136, %11, %cst_29 {dimension_numbers = #tpu.dot_dimension_numbers<[1], [0], [0], [1], [0, 0, 1, 1], [], []>} : vector<8x32xf32>, vector<32x128xf32>, vector<8x128xf32> -> vector<8x128xf32>
    %139 = arith.addf %137, %138 : vector<8x128xf32>
    %140 = arith.mulf %139, %20 : vector<8x128xf32>
    %141 = math.tanh %140 : vector<8x128xf32>
    %cst_30 = arith.constant 5.000000e-01 : f32
    %142 = vector.broadcast %cst_30 : f32 to vector<8x128xf32>
    %143 = arith.mulf %142, %141 : vector<8x128xf32>
    %cst_31 = arith.constant 5.000000e-01 : f32
    %144 = vector.broadcast %cst_31 : f32 to vector<8x128xf32>
    %145 = arith.addf %143, %144 : vector<8x128xf32>
    %146 = arith.select %17, %141, %145 : vector<8x128xi1>, vector<8x128xf32>
    %147 = vector.extract_strided_slice %146 {offsets = [0, 0], sizes = [8, 32], strides = [1, 1]} : vector<8x128xf32> to vector<8x32xf32>
    %148 = vector.extract_strided_slice %146 {offsets = [0, 32], sizes = [8, 32], strides = [1, 1]} : vector<8x128xf32> to vector<8x32xf32>
    %149 = vector.extract_strided_slice %146 {offsets = [0, 64], sizes = [8, 32], strides = [1, 1]} : vector<8x128xf32> to vector<8x32xf32>
    %150 = vector.extract_strided_slice %146 {offsets = [0, 96], sizes = [8, 32], strides = [1, 1]} : vector<8x128xf32> to vector<8x32xf32>
    %151 = arith.mulf %148, %134 : vector<8x32xf32>
    %152 = arith.mulf %147, %149 : vector<8x32xf32>
    %153 = arith.addf %151, %152 : vector<8x32xf32>
    %154 = math.tanh %153 : vector<8x32xf32>
    %155 = arith.mulf %150, %154 : vector<8x32xf32>
    %156 = vector.extract_strided_slice %10 {offsets = [56, 0], sizes = [8, 128], strides = [1, 1]} : vector<64x128xf32> to vector<8x128xf32>
    %cst_32 = arith.constant dense<0.000000e+00> : vector<8x128xf32>
    %157 = tpu.matmul %155, %11, %cst_32 {dimension_numbers = #tpu.dot_dimension_numbers<[1], [0], [0], [1], [0, 0, 1, 1], [], []>} : vector<8x32xf32>, vector<32x128xf32>, vector<8x128xf32> -> vector<8x128xf32>
    %158 = arith.addf %156, %157 : vector<8x128xf32>
    %159 = arith.mulf %158, %20 : vector<8x128xf32>
    %160 = math.tanh %159 : vector<8x128xf32>
    %cst_33 = arith.constant 5.000000e-01 : f32
    %161 = vector.broadcast %cst_33 : f32 to vector<8x128xf32>
    %162 = arith.mulf %161, %160 : vector<8x128xf32>
    %cst_34 = arith.constant 5.000000e-01 : f32
    %163 = vector.broadcast %cst_34 : f32 to vector<8x128xf32>
    %164 = arith.addf %162, %163 : vector<8x128xf32>
    %165 = arith.select %17, %160, %164 : vector<8x128xi1>, vector<8x128xf32>
    %166 = vector.extract_strided_slice %165 {offsets = [0, 0], sizes = [8, 32], strides = [1, 1]} : vector<8x128xf32> to vector<8x32xf32>
    %167 = vector.extract_strided_slice %165 {offsets = [0, 32], sizes = [8, 32], strides = [1, 1]} : vector<8x128xf32> to vector<8x32xf32>
    %168 = vector.extract_strided_slice %165 {offsets = [0, 64], sizes = [8, 32], strides = [1, 1]} : vector<8x128xf32> to vector<8x32xf32>
    %169 = vector.extract_strided_slice %165 {offsets = [0, 96], sizes = [8, 32], strides = [1, 1]} : vector<8x128xf32> to vector<8x32xf32>
    %170 = arith.mulf %167, %153 : vector<8x32xf32>
    %171 = arith.mulf %166, %168 : vector<8x32xf32>
    %172 = arith.addf %170, %171 : vector<8x32xf32>
    %173 = math.tanh %172 : vector<8x32xf32>
    %174 = arith.mulf %169, %173 : vector<8x32xf32>
    %175 = tpu.concatenate %41, %60, %79, %98, %117, %136, %155, %174 in 0 : vector<8x32xf32>, vector<8x32xf32>, vector<8x32xf32>, vector<8x32xf32>, vector<8x32xf32>, vector<8x32xf32>, vector<8x32xf32>, vector<8x32xf32> -> vector<64x32xf32>
    %c0_35 = arith.constant 0 : index
    %c0_36 = arith.constant 0 : index
    %176 = vector.load %arg5[%c0_35, %c0_36] : memref<32x128xf32, #tpu.memory_space<vmem>>, vector<32x128xf32>
    %cst_37 = arith.constant dense<0.000000e+00> : vector<64x128xf32>
    %177 = tpu.matmul %175, %176, %cst_37 {dimension_numbers = #tpu.dot_dimension_numbers<[1], [0], [0], [1], [0, 0, 1, 1], [], []>} : vector<64x32xf32>, vector<32x128xf32>, vector<64x128xf32> -> vector<64x128xf32>
    %c0_38 = arith.constant 0 : index
    %c0_39 = arith.constant 0 : index
    %178 = vector.load %arg6[%c0_38, %c0_39] : memref<1x128xf32, #tpu.memory_space<vmem>>, vector<1x128xf32>
    %179 = vector.broadcast %178 : vector<1x128xf32> to vector<64x128xf32>
    %180 = arith.addf %177, %179 : vector<64x128xf32>
    %cst_40 = arith.constant dense<0xFF800000> : vector<64xf32>
    %181 = vector.multi_reduction <maximumf>, %180, %cst_40 [1] : vector<64x128xf32> to vector<64xf32>
    %182 = vector.shape_cast %181 : vector<64xf32> to vector<64x1xf32>
    %183 = vector.broadcast %182 : vector<64x1xf32> to vector<64x128xf32>
    %184 = arith.subf %180, %183 : vector<64x128xf32>
    %185 = math.exp %184 : vector<64x128xf32>
    %cst_41 = arith.constant dense<0.000000e+00> : vector<64xf32>
    %186 = vector.multi_reduction <add>, %185, %cst_41 [1] : vector<64x128xf32> to vector<64xf32>
    %187 = vector.shape_cast %186 : vector<64xf32> to vector<64x1xf32>
    %188 = math.log %187 : vector<64x1xf32>
    %189 = arith.addf %182, %188 : vector<64x1xf32>
    %190 = vector.broadcast %189 : vector<64x1xf32> to vector<64x128xf32>
    %191 = arith.subf %180, %190 : vector<64x128xf32>
    %c0_42 = arith.constant 0 : index
    %c0_43 = arith.constant 0 : index
    %192 = vector.load %arg7[%c0_42, %c0_43] : memref<64x128xf32, #tpu.memory_space<vmem>>, vector<64x128xf32>
    tpu.vector_store %arg7[%c0_42, %c0_43], %191 {strides = array<i32>} : memref<64x128xf32, #tpu.memory_space<vmem>>, vector<64x128xf32>,
    return
  }
  func.func @transform_0(%arg0: i32) -> (i32, i32) {
    %c0_i32 = arith.constant 0 : i32
    %c0_i32_0 = arith.constant 0 : i32
    return %arg0, %c0_i32 : i32, i32
  }
  func.func @transform_1(%arg0: i32) -> (i32, i32) {
    %c0_i32 = arith.constant 0 : i32
    %c0_i32_0 = arith.constant 0 : i32
    %c0_i32_1 = arith.constant 0 : i32
    return %c0_i32, %c0_i32_0 : i32, i32
  }
  func.func @transform_2(%arg0: i32) -> (i32, i32) {
    %c0_i32 = arith.constant 0 : i32
    %c0_i32_0 = arith.constant 0 : i32
    %c0_i32_1 = arith.constant 0 : i32
    return %c0_i32, %c0_i32_0 : i32, i32
  }
  func.func @transform_3(%arg0: i32) -> (i32, i32) {
    %c0_i32 = arith.constant 0 : i32
    %c0_i32_0 = arith.constant 0 : i32
    %c0_i32_1 = arith.constant 0 : i32
    return %c0_i32, %c0_i32_0 : i32, i32
  }
  func.func @transform_4(%arg0: i32) -> (i32, i32) {
    %c0_i32 = arith.constant 0 : i32
    %c0_i32_0 = arith.constant 0 : i32
    %c0_i32_1 = arith.constant 0 : i32
    return %c0_i32, %c0_i32_0 : i32, i32
  }
  func.func @transform_5(%arg0: i32) -> (i32, i32) {
    %c0_i32 = arith.constant 0 : i32
    %c0_i32_0 = arith.constant 0 : i32
    %c0_i32_1 = arith.constant 0 : i32
    return %c0_i32, %c0_i32_0 : i32, i32
  }
  func.func @transform_6(%arg0: i32) -> (i32, i32) {
    %c0_i32 = arith.constant 0 : i32
    %c0_i32_0 = arith.constant 0 : i32
    return %arg0, %c0_i32 : i32, i32
  }
}

</mosaic_0001>

<bundles_post_ra>
// kernel: tpu_custom_call.1
= control target key start
LH: loop header
LB: loop body
LE: loop exit
PB: predicated region body
PF: predicated region fallthrough
CT: control target
= control target key end

     0   :  { %11 = vsyncpa [#allocation3], 0  ;;  %s2484_s0 = inlined_call_operand.vmem [shape: s32[128,1], index: 0, kind: input, shape index: {}]   ;;  %s2485_s1 = inlined_call_operand.vmem [shape: f32[16,128], index: 1, kind: input, shape index: {}]   ;;  %s2486_s2 = inlined_call_operand.vmem [shape: f32[1,128], index: 2, kind: input, shape index: {}]   ;;  %s2487_s3 = inlined_call_operand.vmem [shape: f32[32,128], index: 3, kind: input, shape index: {}]   ;;  %s2488_s4 = inlined_call_operand.vmem [shape: f32[32,128], index: 4, kind: input, shape index: {}]   ;;  %s2489_s5 = inlined_call_operand.vmem [shape: f32[1,128], index: 5, kind: input, shape index: {}]   ;;  %s2490_s6 = inlined_call_operand.hbm [shape: f32[128,128], index: 6, kind: output, shape index: {}]  }
   0x1   :  { %13 = vsyncpa [#allocation3 + $0x1], 0  ;;  %s2051_s21 = smov 0   ;;  %s2053_s22 = smov 0  }
   0x2   :  { %s2055_s23 = smov 0   ;;  %s2057_s24 = smov 0  }
   0x3 LB: > { %s2072_s25 = sadd.s32 4294967295, %s2004_s24   ;;  %s1534_s26 = sadd.s32 4294967294, %s2004_s24   ;;  %s2004_s24 = sphi %s2057_s24, %s2498_s24   ;;  %s2000_s23 = sphi %s2055_s23, %s2497_s23   ;;  %s1996_s22 = sphi %s2053_s22, %s2496_s22   ;;  %s1992_s21 = sphi %s2051_s21, %s2495_s21  }
   0x4   : > { %s2076_s27 = sadd.s32 1, %s2004_s24   ;;  %s157_s28 = sadd.s32 1, %s2000_s23 }
   0x5   : > { %s154_s29 = ssub.s32 %s2004_s24, %s2076_s27  ;;  %p167_p0 = scmp.ne.s32.totalorder %s2000_s23, %s1996_s22 }
   0x6   : > { %p155_p1 = scmp.eq.s32.totalorder %s154_s29, 0  ;;  %p168_p2 = scmp.eq.s32.totalorder %s2072_s25, 1 }
   0x7   : > { %p173_p3 = scmp.ne.s32.totalorder %s1996_s22, %s1992_s21  ;;  %p174_p4 = scmp.eq.s32.totalorder %s1534_s26, 1 }
   0x8   : > { %s2087_s30 = scalar_select %p155_p1, %s2000_s23, %s157_s28  }
   0x9   : > { %p2089_p5 = por %p168_p2, %p167_p0  ;;  %p2093_p6 = por %p174_p4, %p173_p3 }
   0xa   : > { %p1537_p7 = scmp.ge.s32.totalorder %s2004_s24, 1  ;;  %p216_p8 = scmp.lt.s32.totalorder %s2004_s24, 3 }
   0xc   : > { %p217_p9 = pnand %p1537_p7, %p216_p8 }
   0xd   : > { %s1539_s9 = sshll.u32 (!%p217_p9), %s2072_s25, 3  ;;  %v2006_v0 = vmov (!%p217_p9), 0   ;;  %v311_v5 = vld [vmem:[%s2485_s1] sm:$0xff] (!%p217_p9)  ;;  %v312_v6 = vld [vmem:[%s2485_s1 + $0x8] sm:$0xff] (!%p217_p9)  ;;  %v2007_v10 = vmov (!%p217_p9), 0.0|0.0   ;;  %v261_v11 = vlaneseq (!%p217_p9)  ;;  %vm320_vm0 = vcmask (!%p217_p9), 130048  }
   0xe   : > { %220 = sbr.rel (%p217_p9) target bundleno = 6385 (0x18f1), region = 44  ;;  %1877 = vset.pattern.permute.xlu1 (!%p217_p9), %v2006_v0  ;;  %1876 = vset.pattern.permute.xlu0 (!%p217_p9), %v2006_v0  ;;  %p247_p10 = scmp.lt.s32.totalorder (!%p217_p9), %s1539_s9, 15  ;;  %v1766_v7 = vpack.c.bf16 (!%p217_p9), %v312_v6, %v311_v5  ;;  %v450_v15 = vld [vmem:[%s2487_s3] sm:$0xff] (!%p217_p9)  ;;  %v451_v16 = vld [vmem:[%s2487_s3 + $0x8] sm:$0xff] (!%p217_p9)  ;;  %v2008_v17 = vmov (!%p217_p9), 0.0   ;;  %v452_v22 = vld [vmem:[%s2487_s3 + $0x10] sm:$0xff] (!%p217_p9) }
   0xf   : > { %v2119_v12 = vand.u32 (!%p217_p9), 127, %v261_v11  ;;  %v2131_v21 = vpack.c.bf16 (!%p217_p9), %v451_v16, %v450_v15  ;;  %v453_v23 = vld [vmem:[%s2487_s3 + $0x18] sm:$0xff] (!%p217_p9)  ;;  %vm2009_vm7 = vmmov (!%p217_p9), 0   ;;  %v2183_v36 = vld [vmem:[%s2486_s2] ss:$0 sm:$0xff] (!%p217_p9)  ;;  %v2010_v41 = vmov (!%p217_p9), 0.5  }
  0x10   : > { %1826 = vmatprep.subr.bf16.mxu1 (!%p217_p9), %v1766_v7  ;;  %1767 = vmatprep.subr.bf16.mxu0 (!%p217_p9), %v1766_v7  ;;  %v2148_v29 = vpack.c.bf16 (!%p217_p9), %v453_v23, %v452_v22  ;;  %s2011_s14 = smov (!%p217_p9), 64   ;;  %s2012_s15 = smov (!%p217_p9), 32   ;;  %vm458_vm11 = vcmask (!%p217_p9), 261120  }
  0x11   : > { %1827 = vmatpush3.bf16.msra.mxu1 (!%p217_p9), %v1766_v7  ;;  %1769 = vmatpush3.bf16.msra.mxu0 (!%p217_p9), %v1766_v7  ;;  %vm454_vm8 = vcmp.ge.s32.totalorder (!%p217_p9), %v2119_v12, 64  ;;  %vm455_vm9 = vcmp.lt.s32.totalorder (!%p217_p9), %v2119_v12, 96  ;;  %s2013_s19 = smov (!%p217_p9), [#allocation2]  }
  0x12   : > { %1770 = vmatprep.subr.bf16.mxu1 (!%p217_p9), %v2007_v10  ;;  %1782 = vmatprep.subr.bf16.mxu0 (!%p217_p9), %v2007_v10  ;;  %vm2187_vm10 = vmand (!%p217_p9), %vm454_vm8, %vm455_vm9  ;;  %s1946_s20 = sshll.u32 (!%p217_p9), %s2013_s19, 4  ;;  %s1947_s20 = int_to_ptr.vmem [resolvable:$false] %s1946_s20 }
  0x13   : > { %v2194_v42 = vsel (!%p217_p9), %vm2187_vm10, 1.0, %v2010_v41  ;;  %s1948_s26 = scalar_lea.vmem (!%p217_p9), %s1947_s20, 2048 }
  0x15   : > { %s2500_s9 = smov (!%p247_p10, %s1539_s9), 15 }
  0x16   : > { %s1540_s10 = sshll.u32 %s2500_s9, 3 }
  0x17   : > { %s2103_s13 = scalar_lea.vmem %s2484_s0, %s1540_s10  ;;  %s243_s10 = sand.u32 1, %s1996_s22  }
  0x18   : > { %v259_v1 = vld [vmem:[%s2103_s13 + $0x30] sm:$0xff]  ;;  %v257_v2 = vld [vmem:[%s2103_s13 + $0x20] sm:$0xff]  ;;  %v258_v3 = vld [vmem:[%s2103_s13 + $0x28] sm:$0xff]  ;;  %s1538_s11 = sshll.u32 %s243_s10, 6 }
  0x19   : > { %282 = vperm.xlu1 %1877, %v259_v1   ;;  %276 = vperm.xlu0 %1876, %v257_v2   ;;  %v253_v4 = vld [vmem:[%s2103_s13] sm:$0xff]  ;;  %v260_v8 = vld [vmem:[%s2103_s13 + $0x38] sm:$0xff]  ;;  %v254_v9 = vld [vmem:[%s2103_s13 + $0x8] sm:$0xff]  ;;  %s2412_s12 = scalar_lea.vmem [#allocation2], %s1538_s11 }
  0x1a   : > { %v255_v7 = vld [vmem:[%s2103_s13 + $0x10] sm:$0xff] }
  0x1d   : > { %279 = vperm.xlu0 %1876, %v258_v3   ;;  %264 = vperm.xlu1 %1877, %v253_v4  }
  0x21   : > { %285 = vperm.xlu0 %1876, %v260_v8   ;;  %267 = vperm.xlu1 %1877, %v254_v9  }
  0x98   : > { %v283_v13 = vpop.permute.xlu1 %282  ;;  %v277_v14 = vpop.permute.xlu0 %276 }
  0x99   : > { %vm291_vm1 = vcmp.eq.s32.totalorder %v2119_v12, %v277_v14  ;;  %vm293_vm2 = vcmp.eq.s32.totalorder %v2119_v12, %v283_v13  ;;  %v256_v14 = vld [vmem:[%s2103_s13 + $0x18] sm:$0xff] }
  0x9a   : > { %v1545_v18 = vsel %vm291_vm1, 1.0, %v2008_v17  ;;  %v1547_v26 = vsel %vm293_vm2, 1.0, %v2008_v17 }
  0x9b   : > { %1652 = vmatprep.mubr.msk.f32.mxu1 %vm320_vm0, %v1545_v18 }
  0x9c   : > { %v280_v19 = vpop.permute.xlu0 %279  ;;  %v265_v20 = vpop.permute.xlu1 %264 }
  0x9d   : > { %vm292_vm3 = vcmp.eq.s32.totalorder %v2119_v12, %v280_v19  ;;  %vm287_vm4 = vcmp.eq.s32.totalorder %v2119_v12, %v265_v20 }
  0x9e   : > { %v1546_v24 = vsel %vm292_vm3, 1.0, %v2008_v17  ;;  %v1541_v25 = vsel %vm287_vm4, 1.0, %v2008_v17 }
  0x9f   : > { %1646 = vmatprep.mubr.msk.f32.mxu0 %vm320_vm0, %v1541_v25  ;;  %1653 = vmatmul.mubr.msk.f32.vlgmr.msra.gmra.mrb[0].mxu1 %vm320_vm0, %v1546_v24 }
  0xa0   : > { %1772 = vmatpush3.bf16.msra.mxu1 %v2131_v21  ;;  %1655 = vmatprep.mubr.msk.f32.mxu1 %vm320_vm0, %v1547_v26  ;;  %v286_v27 = vpop.permute.xlu0 %285  ;;  %v268_v28 = vpop.permute.xlu1 %267 }
  0xa1   : > { %vm294_vm5 = vcmp.eq.s32.totalorder %v2119_v12, %v286_v27  ;;  %vm288_vm6 = vcmp.eq.s32.totalorder %v2119_v12, %v268_v28  ;;  %1773 = vmatprep.subr.bf16.mxu1 %v2007_v10 }
  0xa2   : > { %v1548_v30 = vsel %vm294_vm5, 1.0, %v2008_v17  ;;  %v1542_v31 = vsel %vm288_vm6, 1.0, %v2008_v17 }
  0xa3   : > { %1647 = vmatmul.mubr.msk.f32.vlgmr.msra.gmra.mrb[0].mxu0 %vm320_vm0, %v1542_v31  ;;  %1656 = vmatmul.mubr.msk.f32.gmra.mrb[2].mxu1 %vm320_vm0, %v1548_v30 }
  0xa4   : > { %1775 = vmatpush3.bf16.msra.mxu1 %v2148_v29  ;;  %1666 = vmatprep.mubr.msk.f32.mxu1 %vm2009_vm7, %v2008_v17 }
  0xa5   : > { %1776 = vmatprep.subr.bf16.mxu1 %v2007_v10  ;;  %1784 = vmatpush3.bf16.msra.mxu0 %v2131_v21 }
  0xa6   : > { %1785 = vmatprep.subr.bf16.mxu0 %v2007_v10 }
  0xa7   : > { %1667 = vmatmul.mubr.f32.vlgmr.msra.gmra.mrb[4].mxu1 %v2008_v17 }
  0xa8   : > { %1778 = vmatpush3.bf16.msra.mxu1 %v2131_v21  ;;  %1677 = vmatprep.mubr.msk.f32.mxu1 %vm2009_vm7, %v2008_v17 }
  0xa9   : > { %1779 = vmatprep.subr.bf16.mxu1 %v2007_v10  ;;  %1787 = vmatpush3.bf16.msra.mxu0 %v2148_v29 }
  0xaa   : > { %1794 = vmatprep.subr.bf16.mxu0 %v2007_v10 }
  0xac   : > { %1781 = vmatpush3.bf16.msra.mxu1 %v2148_v29 }
  0xad   : > { %1788 = vmatprep.subr.bf16.mxu1 %v2007_v10 }
 0x172   : > { %v2172_v32 = vpop.f32.mrb[0].mxu1 }
 0x173   : > { %v2174_v33 = vpop.f32.mrb[1].mxu1 }
 0x176   : > { %v1648_v34 = vpop.f32.mrb[0].mxu0  ;;  %v2178_v35 = vpop.f32.mrb[2].mxu1 }
 0x177   : > { %v411_v37 = vpop.f32.mrb[1].mxu0  ;;  %v2185_v38 = vpop.f32.mrb[3].mxu1  ;;  %v417_v60 = vadd.f32 %v1648_v34, %v2183_v36 }
 0x178   : > { %v412_v40 = vadd.f32 %v2183_v36, %v411_v37 }
 0x17a   : > { %v528_v43 = vpop.f32.mrb[4].mxu1 }
 0x17b   : > { %v532_v44 = vadd.f32 %v528_v43, %v412_v40  ;;  %v1668_v45 = vpop.f32.mrb[5].mxu1 }
 0x17d   : > { %v533_v46 = vmul.f32 %v532_v44, %v2194_v42 }
 0x17f   : > { %1878 = vtanh.f32 %v533_v46 }
 0x189   : > { %v1879_v47 = vpop.eup %1878 }
 0x18a   : > { %v535_v48 = vmul.f32 0.5, %v1879_v47 }
 0x18c   : > { %v536_v49 = vadd.f32 0.5, %v535_v48 }
 0x18e   : > { %v537_v50 = vsel %vm2187_vm10, %v1879_v47, %v536_v49 }
 0x18f   : > { %540 = vrot.lane.b32.xlu0 %v537_v50, %s2011_s14  ;;  %v538_v53 = vmul.f32 0.0, %v537_v50 }
 0x201   : > { %v541_v51 = vpop.permute.xlu0 %540 }
 0x202   : > { %v543_v52 = vmul.f32 %v541_v51, %v537_v50 }
 0x204   : > { %545 = vrot.lane.b32.xlu1 %v543_v52, %s2012_s15 }
 0x276   : > { %v546_v54 = vpop.permute.xlu1 %545 }
 0x277   : > { %v548_v55 = vadd.f32 %v546_v54, %v538_v53 }
 0x279   : > { %1880 = vtanh.f32 %v548_v55 }
 0x283   : > { %v1881_v56 = vpop.eup %1880 }
 0x284   : > { %551 = vrot.lane.b32.xlu0 %v1881_v56, %s2011_s14 }
 0x2f6   : > { %v552_v57 = vpop.permute.xlu0 %551 }
 0x2f7   : > { %v554_v58 = vmul.f32 %v552_v57, %v537_v50 }
 0x2f9   : > { %556 = vrot.lane.b32.xlu1 %v554_v58, %s2012_s15 }
 0x36b   : > { %v2203_v59 = vpop.permute.xlu1 %556 }
 0x36c   : > { %1678 = vmatmul.mubr.msk.f32.vlgmr.msra.gmra.mrb[6].mxu1 %vm458_vm11, %v2203_v59 }
 0x36d   : > { %1790 = vmatpush3.bf16.msra.mxu1 %v2131_v21  ;;  %1699 = vmatprep.mubr.msk.f32.mxu1 %vm2009_vm7, %v2008_v17 }
 0x36e   : > { %1791 = vmatprep.subr.bf16.mxu1 %v2007_v10 }
 0x371   : > { %1793 = vmatpush3.bf16.msra.mxu1 %v2148_v29 }
 0x372   : > { %1800 = vmatprep.subr.bf16.mxu1 %v2007_v10 }
 0x43f   : > { %v626_v61 = vpop.f32.mrb[6].mxu1 }
 0x440   : > { %v630_v62 = vadd.f32 %v626_v61, %v417_v60  ;;  %v1679_v63 = vpop.f32.mrb[7].mxu1 }
 0x442   : > { %v631_v0 = vmul.f32 %v630_v62, %v2194_v42 }
 0x444   : > { %1882 = vtanh.f32 %v631_v0 }
 0x44e   : > { %v1883_v1 = vpop.eup %1882 }
 0x44f   : > { %v633_v2 = vmul.f32 0.5, %v1883_v1 }
 0x451   : > { %v634_v3 = vadd.f32 0.5, %v633_v2 }
 0x453   : > { %v635_v4 = vsel %vm2187_vm10, %v1883_v1, %v634_v3 }
 0x454   : > { %638 = vrot.lane.b32.xlu0 %v635_v4, %s2011_s14  ;;  %v636_v8 = vmul.f32 %v635_v4, %v548_v55 }
 0x4c6   : > { %v639_v5 = vpop.permute.xlu0 %638 }
 0x4c7   : > { %v641_v6 = vmul.f32 %v639_v5, %v635_v4 }
 0x4c9   : > { %643 = vrot.lane.b32.xlu1 %v641_v6, %s2012_s15  ;;  %v432_v6 = vadd.f32 %v2183_v36, %v2174_v33 }
 0x4cd   : > { %270 = vperm.xlu1 %1877, %v255_v7  }
 0x53b   : > { %v644_v9 = vpop.permute.xlu1 %643 }
 0x53c   : > { %v646_v11 = vadd.f32 %v644_v9, %v636_v8 }
 0x53e   : > { %1884 = vtanh.f32 %v646_v11 }
 0x548   : > { %v1885_v13 = vpop.eup %1884 }
 0x549   : > { %649 = vrot.lane.b32.xlu0 %v1885_v13, %s2011_s14 }
 0x54c   : > { %v271_v15 = vpop.permute.xlu1 %270 }
 0x54d   : > { %vm289_vm12 = vcmp.eq.s32.totalorder %v2119_v12, %v271_v15  ;;  %273 = vperm.xlu0 %1876, %v256_v14  }
 0x54e   : > { %v1543_v16 = vsel %vm289_vm12, 1.0, %v2008_v17 }
 0x54f   : > { %1649 = vmatprep.mubr.msk.f32.mxu0 %vm320_vm0, %v1543_v16 }
 0x5bb   : > { %v650_v18 = vpop.permute.xlu0 %649 }
 0x5bc   : > { %v652_v19 = vmul.f32 %v650_v18, %v635_v4 }
 0x5be   : > { %654 = vrot.lane.b32.xlu1 %v652_v19, %s2012_s15 }
 0x5cc   : > { %v274_v20 = vpop.permute.xlu0 %273 }
 0x5cd   : > { %vm290_vm13 = vcmp.eq.s32.totalorder %v2119_v12, %v274_v20 }
 0x5ce   : > { %v1544_v22 = vsel %vm290_vm13, 1.0, %v2008_v17 }
 0x5cf   : > { %1650 = vmatmul.mubr.msk.f32.gmra.mrb[2].mxu0 %vm320_vm0, %v1544_v22 }
 0x5d0   : > { %1688 = vmatprep.mubr.msk.f32.mxu0 %vm2009_vm7, %v2008_v17 }
 0x630   : > { %v2231_v23 = vpop.permute.xlu1 %654 }
 0x631   : > { %1689 = vmatmul.mubr.msk.f32.vlgmr.msra.gmra.mrb[4].mxu0 %vm458_vm11, %v2231_v23 }
 0x632   : > { %1796 = vmatpush3.bf16.msra.mxu0 %v2131_v21  ;;  %1710 = vmatprep.mubr.msk.f32.mxu0 %vm2009_vm7, %v2008_v17 }
 0x633   : > { %1797 = vmatprep.subr.bf16.mxu0 %v2007_v10 }
 0x636   : > { %1799 = vmatpush3.bf16.msra.mxu0 %v2148_v29 }
 0x637   : > { %1806 = vmatprep.subr.bf16.mxu0 %v2007_v10 }
 0x6a2   : > { %v1651_v12 = vpop.f32.mrb[2].mxu0 }
 0x6a3   : > { %v421_v24 = vpop.f32.mrb[3].mxu0  ;;  %v427_v51 = vadd.f32 %v1651_v12, %v2183_v36 }
 0x6a4   : > { %v422_v25 = vadd.f32 %v2183_v36, %v421_v24 }
 0x704   : > { %v724_v26 = vpop.f32.mrb[4].mxu0 }
 0x705   : > { %v728_v27 = vadd.f32 %v724_v26, %v422_v25  ;;  %v1690_v28 = vpop.f32.mrb[5].mxu0 }
 0x707   : > { %v729_v30 = vmul.f32 %v728_v27, %v2194_v42  ;;  %v437_v27 = vadd.f32 %v2172_v32, %v2183_v36 }
 0x709   : > { %1886 = vtanh.f32 %v729_v30 }
 0x713   : > { %v1887_v31 = vpop.eup %1886 }
 0x714   : > { %v731_v34 = vmul.f32 0.5, %v1887_v31 }
 0x716   : > { %v732_v37 = vadd.f32 0.5, %v731_v34 }
 0x718   : > { %v733_v40 = vsel %vm2187_vm10, %v1887_v31, %v732_v37 }
 0x719   : > { %736 = vrot.lane.b32.xlu0 %v733_v40, %s2011_s14  ;;  %v734_v44 = vmul.f32 %v733_v40, %v646_v11 }
 0x78b   : > { %v737_v41 = vpop.permute.xlu0 %736 }
 0x78c   : > { %v739_v43 = vmul.f32 %v737_v41, %v733_v40 }
 0x78e   : > { %741 = vrot.lane.b32.xlu1 %v739_v43, %s2012_s15 }
 0x800   : > { %v742_v45 = vpop.permute.xlu1 %741 }
 0x801   : > { %v744_v46 = vadd.f32 %v742_v45, %v734_v44  ;;  %v1241_v44 = vld [vmem:[%s2488_s4] sm:$0xff]  ;;  %v1242_v45 = vld [vmem:[%s2488_s4 + $0x8] sm:$0xff] }
 0x803   : > { %1888 = vtanh.f32 %v744_v46 }
 0x80d   : > { %v1889_v47 = vpop.eup %1888 }
 0x80e   : > { %747 = vrot.lane.b32.xlu0 %v1889_v47, %s2011_s14 }
 0x880   : > { %v748_v48 = vpop.permute.xlu0 %747 }
 0x881   : > { %v750_v49 = vmul.f32 %v748_v48, %v733_v40 }
 0x883   : > { %752 = vrot.lane.b32.xlu1 %v750_v49, %s2012_s15 }
 0x8f5   : > { %v2249_v50 = vpop.permute.xlu1 %752 }
 0x8f6   : > { %1700 = vmatmul.mubr.msk.f32.vlgmr.msra.gmra.mrb[8].mxu1 %vm458_vm11, %v2249_v50 }
 0x8f7   : > { %1802 = vmatpush3.bf16.msra.mxu1 %v2131_v21  ;;  %1721 = vmatprep.mubr.msk.f32.mxu1 %vm2009_vm7, %v2008_v17 }
 0x8f8   : > { %1803 = vmatprep.subr.bf16.mxu1 %v2007_v10 }
 0x8fb   : > { %1805 = vmatpush3.bf16.msra.mxu1 %v2148_v29 }
 0x8fc   : > { %1812 = vmatprep.subr.bf16.mxu1 %v2007_v10 }
 0x9c9   : > { %v822_v52 = vpop.f32.mrb[8].mxu1 }
 0x9ca   : > { %v826_v53 = vadd.f32 %v822_v52, %v427_v51  ;;  %v1701_v54 = vpop.f32.mrb[9].mxu1  ;;  %v1243_v51 = vld [vmem:[%s2488_s4 + $0x10] sm:$0xff]  ;;  %v1244_v52 = vld [vmem:[%s2488_s4 + $0x18] sm:$0xff] }
 0x9cc   : > { %v827_v55 = vmul.f32 %v826_v53, %v2194_v42  ;;  %v1822_v53 = vpack.c.bf16 %v1244_v52, %v1243_v51 }
 0x9ce   : > { %1890 = vtanh.f32 %v827_v55  ;;  %v442_v55 = vadd.f32 %v2183_v36, %v2185_v38 }
 0x9d8   : > { %v1891_v56 = vpop.eup %1890 }
 0x9d9   : > { %v829_v57 = vmul.f32 0.5, %v1891_v56 }
 0x9db   : > { %v830_v58 = vadd.f32 0.5, %v829_v57 }
 0x9dd   : > { %v831_v60 = vsel %vm2187_vm10, %v1891_v56, %v830_v58 }
 0x9de   : > { %834 = vrot.lane.b32.xlu0 %v831_v60, %s2011_s14  ;;  %v832_v63 = vmul.f32 %v831_v60, %v744_v46  ;;  %v1818_v46 = vpack.c.bf16 %v1242_v45, %v1241_v44 }
 0xa50   : > { %v835_v61 = vpop.permute.xlu0 %834 }
 0xa51   : > { %v837_v62 = vmul.f32 %v835_v61, %v831_v60 }
 0xa53   : > { %839 = vrot.lane.b32.xlu1 %v837_v62, %s2012_s15 }
 0xac5   : > { %v840_v0 = vpop.permute.xlu1 %839 }
 0xac6   : > { %v842_v1 = vadd.f32 %v840_v0, %v832_v63 }
 0xac8   : > { %1892 = vtanh.f32 %v842_v1 }
 0xad2   : > { %v1893_v2 = vpop.eup %1892 }
 0xad3   : > { %845 = vrot.lane.b32.xlu0 %v1893_v2, %s2011_s14 }
 0xb45   : > { %v846_v3 = vpop.permute.xlu0 %845 }
 0xb46   : > { %v848_v4 = vmul.f32 %v846_v3, %v831_v60 }
 0xb48   : > { %850 = vrot.lane.b32.xlu1 %v848_v4, %s2012_s15 }
 0xbba   : > { %v2267_v5 = vpop.permute.xlu1 %850 }
 0xbbb   : > { %1711 = vmatmul.mubr.msk.f32.vlgmr.msra.gmra.mrb[6].mxu0 %vm458_vm11, %v2267_v5 }
 0xbbc   : > { %1808 = vmatpush3.bf16.msra.mxu0 %v2131_v21  ;;  %1732 = vmatprep.mubr.msk.f32.mxu0 %vm2009_vm7, %v2008_v17 }
 0xbbd   : > { %1809 = vmatprep.subr.bf16.mxu0 %v2007_v10 }
 0xbc0   : > { %1811 = vmatpush3.bf16.msra.mxu0 %v2148_v29 }
 0xbc1   : > { %1819 = vmatprep.subr.bf16.mxu0 %v1818_v46 }
 0xc8e   : > { %v920_v7 = vpop.f32.mrb[6].mxu0 }
 0xc8f   : > { %v924_v8 = vadd.f32 %v920_v7, %v432_v6  ;;  %v1712_v9 = vpop.f32.mrb[7].mxu0 }
 0xc91   : > { %v925_v11 = vmul.f32 %v924_v8, %v2194_v42 }
 0xc93   : > { %1894 = vtanh.f32 %v925_v11 }
 0xc9d   : > { %v1895_v13 = vpop.eup %1894 }
 0xc9e   : > { %v927_v14 = vmul.f32 0.5, %v1895_v13 }
 0xca0   : > { %v928_v15 = vadd.f32 0.5, %v927_v14  ;;  %v447_v14 = vadd.f32 %v2178_v35, %v2183_v36 }
 0xca2   : > { %v929_v16 = vsel %vm2187_vm10, %v1895_v13, %v928_v15 }
 0xca3   : > { %932 = vrot.lane.b32.xlu0 %v929_v16, %s2011_s14  ;;  %v930_v20 = vmul.f32 %v929_v16, %v842_v1 }
 0xd15   : > { %v933_v18 = vpop.permute.xlu0 %932 }
 0xd16   : > { %v935_v19 = vmul.f32 %v933_v18, %v929_v16 }
 0xd18   : > { %937 = vrot.lane.b32.xlu1 %v935_v19, %s2012_s15 }
 0xd8a   : > { %v938_v33 = vpop.permute.xlu1 %937 }
 0xd8b   : > { %v940_v22 = vadd.f32 %v938_v33, %v930_v20 }
 0xd8d   : > { %1896 = vtanh.f32 %v940_v22 }
 0xd97   : > { %v1897_v12 = vpop.eup %1896 }
 0xd98   : > { %943 = vrot.lane.b32.xlu0 %v1897_v12, %s2011_s14 }
 0xe0a   : > { %v944_v24 = vpop.permute.xlu0 %943 }
 0xe0b   : > { %v946_v25 = vmul.f32 %v944_v24, %v929_v16 }
 0xe0d   : > { %948 = vrot.lane.b32.xlu1 %v946_v25, %s2012_s15 }
 0xe7f   : > { %v949_v26 = vpop.permute.xlu1 %948 }
 0xe80   : > { %1722 = vmatmul.mubr.msk.f32.vlgmr.msra.gmra.mrb[10].mxu1 %vm458_vm11, %v949_v26 }
 0xe81   : > { %1814 = vmatpush3.bf16.msra.mxu1 %v2131_v21  ;;  %1743 = vmatprep.mubr.msk.f32.mxu1 %vm2009_vm7, %v2008_v17 }
 0xe82   : > { %1815 = vmatprep.subr.bf16.mxu1 %v2007_v10 }
 0xe85   : > { %1817 = vmatpush3.bf16.msra.mxu1 %v2148_v29 }
 0xf53   : > { %v1018_v28 = vpop.f32.mrb[10].mxu1 }
 0xf54   : > { %v1022_v30 = vadd.f32 %v1018_v28, %v437_v27  ;;  %v1723_v31 = vpop.f32.mrb[11].mxu1 }
 0xf56   : > { %v1023_v34 = vmul.f32 %v1022_v30, %v2194_v42 }
 0xf58   : > { %1898 = vtanh.f32 %v1023_v34 }
 0xf62   : > { %v1899_v37 = vpop.eup %1898 }
 0xf63   : > { %v1025_v40 = vmul.f32 0.5, %v1899_v37 }
 0xf65   : > { %v1026_v41 = vadd.f32 0.5, %v1025_v40 }
 0xf67   : > { %v1027_v21 = vsel %vm2187_vm10, %v1899_v37, %v1026_v41 }
 0xf68   : > { %1030 = vrot.lane.b32.xlu0 %v1027_v21, %s2011_s14  ;;  %v1028_v29 = vmul.f32 %v1027_v21, %v940_v22 }
 0xfda   : > { %v1031_v10 = vpop.permute.xlu0 %1030 }
 0xfdb   : > { %v1033_v17 = vmul.f32 %v1031_v10, %v1027_v21 }
 0xfdd   : > { %1035 = vrot.lane.b32.xlu1 %v1033_v17, %s2012_s15 }
0x104f   : > { %v1036_v32 = vpop.permute.xlu1 %1035 }
0x1050   : > { %v1038_v43 = vadd.f32 %v1036_v32, %v1028_v29 }
0x1052   : > { %1900 = vtanh.f32 %v1038_v43 }
0x105c   : > { %v1901_v47 = vpop.eup %1900 }
0x105d   : > { %1041 = vrot.lane.b32.xlu0 %v1901_v47, %s2011_s14 }
0x10cf   : > { %v1042_v48 = vpop.permute.xlu0 %1041 }
0x10d0   : > { %v1044_v49 = vmul.f32 %v1042_v48, %v1027_v21 }
0x10d2   : > { %1046 = vrot.lane.b32.xlu1 %v1044_v49, %s2012_s15 }
0x1144   : > { %v1047_v54 = vpop.permute.xlu1 %1046 }
0x1145   : > { %1733 = vmatmul.mubr.msk.f32.vlgmr.msra.gmra.mrb[8].mxu0 %vm458_vm11, %v1047_v54 }
0x1146   : > { %1821 = vmatpush3.bf16.msra.mxu0 %v1818_v46  ;;  %1754 = vmatprep.mubr.msk.f32.mxu0 %vm458_vm11, %v2203_v59 }
0x1147   : > { %1823 = vmatprep.subr.bf16.mxu0 %v1822_v53 }
0x114a   : > { %1825 = vmatpush3.bf16.msra.mxu0 %v1822_v53 }
0x114d   : > { %1755 = vmatmul.mubr.msk.f32.vlgmr.msra.gmra.mrb[10].mxu0 %vm458_vm11, %v2231_v23 }
0x114e   : > { %1757 = vmatprep.mubr.msk.f32.mxu0 %vm458_vm11, %v2249_v50 }
0x1151   : > { %1758 = vmatmul.mubr.msk.f32.gmra.mrb[12].mxu0 %vm458_vm11, %v2267_v5 }
0x1152   : > { %1760 = vmatprep.mubr.msk.f32.mxu0 %vm458_vm11, %v949_v26 }
0x1155   : > { %1761 = vmatmul.mubr.msk.f32.gmra.mrb[14].mxu0 %vm458_vm11, %v1047_v54 }
0x1218   : > { %v1116_v56 = vpop.f32.mrb[8].mxu0 }
0x1219   : > { %v1120_v59 = vadd.f32 %v1116_v56, %v442_v55  ;;  %v1734_v57 = vpop.f32.mrb[9].mxu0 }
0x121b   : > { %v1121_v58 = vmul.f32 %v1120_v59, %v2194_v42 }
0x121d   : > { %1902 = vtanh.f32 %v1121_v58 }
0x1220   : > { %v1756_v23 = vpop.f32.mrb[10].mxu0 }
0x1221   : > { %v1323_v60 = vpop.f32.mrb[11].mxu0 }
0x1224   : > { %v1759_v61 = vpop.f32.mrb[12].mxu0 }
0x1225   : > { %v1333_v50 = vpop.f32.mrb[13].mxu0 }
0x1227   : > { %v1903_v62 = vpop.eup %1902 }
0x1228   : > { %v1762_v63 = vpop.f32.mrb[14].mxu0  ;;  %v1123_v0 = vmul.f32 0.5, %v1903_v62 }
0x1229   : > { %v1343_v1 = vpop.f32.mrb[15].mxu0 }
0x122a   : > { %v1124_v2 = vadd.f32 0.5, %v1123_v0 }
0x122c   : > { %v1125_v3 = vsel %vm2187_vm10, %v1903_v62, %v1124_v2 }
0x122d   : > { %1128 = vrot.lane.b32.xlu0 %v1125_v3, %s2011_s14  ;;  %v1126_v5 = vmul.f32 %v1125_v3, %v1038_v43 }
0x129f   : > { %v1129_v38 = vpop.permute.xlu0 %1128 }
0x12a0   : > { %v1131_v4 = vmul.f32 %v1129_v38, %v1125_v3 }
0x12a2   : > { %1133 = vrot.lane.b32.xlu1 %v1131_v4, %s2012_s15 }
0x1314   : > { %v1134_v6 = vpop.permute.xlu1 %1133 }
0x1315   : > { %v1136_v7 = vadd.f32 %v1134_v6, %v1126_v5 }
0x1317   : > { %1904 = vtanh.f32 %v1136_v7 }
0x1321   : > { %v1905_v8 = vpop.eup %1904 }
0x1322   : > { %1139 = vrot.lane.b32.xlu0 %v1905_v8, %s2011_s14 }
0x1394   : > { %v1140_v9 = vpop.permute.xlu0 %1139 }
0x1395   : > { %v1142_v11 = vmul.f32 %v1140_v9, %v1125_v3 }
0x1397   : > { %1144 = vrot.lane.b32.xlu1 %v1142_v11, %s2012_s15 }
0x1409   : > { %v1145_v13 = vpop.permute.xlu1 %1144 }
0x140a   : > { %1744 = vmatmul.mubr.msk.f32.vlgmr.msra.gmra.mrb[12].mxu1 %vm458_vm11, %v1145_v13  ;;  %1763 = vmatprep.mubr.msk.f32.mxu0 %vm458_vm11, %v1145_v13 }
0x14dd   : > { %v1214_v15 = vpop.f32.mrb[12].mxu1 }
0x14de   : > { %v1218_v16 = vadd.f32 %v1214_v15, %v447_v14  ;;  %v1745_v18 = vpop.f32.mrb[13].mxu1 }
0x14e0   : > { %v1219_v19 = vmul.f32 %v1218_v16, %v2194_v42  ;;  %v1565_v42 = vld [vmem:[%s2489_s5] ss:$0 sm:$0xff] }
0x14e1   : > { %v2345_v28 = vadd.f32 %v1565_v42, %v1323_v60  ;;  %v2348_v39 = vadd.f32 %v1565_v42, %v1333_v50  ;;  %v2351_v30 = vadd.f32 %v1759_v61, %v1565_v42  ;;  %v2354_v31 = vadd.f32 %v1762_v63, %v1565_v42 }
0x14e2   : > { %1906 = vtanh.f32 %v1219_v19  ;;  %v2358_v40 = vadd.f32 %v1756_v23, %v1565_v42  ;;  %v2361_v41 = vadd.f32 %v1565_v42, %v1343_v1 }
0x14ec   : > { %v1907_v20 = vpop.eup %1906 }
0x14ed   : > { %v1221_v33 = vmul.f32 0.5, %v1907_v20 }
0x14ef   : > { %v1222_v22 = vadd.f32 0.5, %v1221_v33 }
0x14f1   : > { %v1223_v12 = vsel %vm2187_vm10, %v1907_v20, %v1222_v22 }
0x14f2   : > { %1226 = vrot.lane.b32.xlu0 %v1223_v12, %s2011_s14  ;;  %v1224_v26 = vmul.f32 %v1223_v12, %v1136_v7 }
0x1564   : > { %v1227_v24 = vpop.permute.xlu0 %1226 }
0x1565   : > { %v1229_v25 = vmul.f32 %v1227_v24, %v1223_v12 }
0x1567   : > { %1231 = vrot.lane.b32.xlu1 %v1229_v25, %s2012_s15 }
0x15d9   : > { %v1232_v35 = vpop.permute.xlu1 %1231 }
0x15da   : > { %v1234_v36 = vadd.f32 %v1232_v35, %v1224_v26 }
0x15dc   : > { %1908 = vtanh.f32 %v1234_v36 }
0x15e6   : > { %v1909_v27 = vpop.eup %1908 }
0x15e7   : > { %1237 = vrot.lane.b32.xlu0 %v1909_v27, %s2011_s14  ;;  %s1579_s14 = sshll.u32 %s2072_s25, 10  ;;  %s2443_s25 = scalar_lea.sflag [#allocation3], %s243_s10 }
0x15e8   : > { %s2434_s17 = scalar_lea.hbm %s2490_s6, %s1579_s14 }
0x1606   : > { %1362 = vmax.xlane.f32.xlu0 %v2345_v28 }
0x160a   : > { %1366 = vmax.xlane.f32.xlu0 %v2348_v39 }
0x160e   : > { %1368 = vmax.xlane.f32.xlu0 %v2351_v30 }
0x1612   : > { %1372 = vmax.xlane.f32.xlu0 %v2354_v31 }
0x1659   : > { %v1238_v34 = vpop.permute.xlu0 %1237 }
0x165a   : > { %v1240_v37 = vmul.f32 %v1238_v34, %v1223_v12 }
0x165c   : > { %1253 = vrot.lane.b32.xlu1 %v1240_v37, %s2012_s15  ;;  %s1472_s15 = sshll.u32 %s2412_s12, 4  ;;  %s2436_s15 = int_to_ptr.vmem [resolvable:$true] %s1472_s15 }
0x165d   : > { %s1942_s18 = scalar_lea.vmem %s2436_s15, 1024  ;;  %p1949_p0 = scmp.lt.s32.totalorder %s2436_s15, %s1947_s20 }
0x165e   : > { %p1943_p11 = scmp.ne.s32.totalorder %s2436_s15, %s1942_s18  ;;  %p1950_p1 = scmp.lt.s32.totalorder %s1948_s26, %s1942_s18 }
0x1660   : > { %p1944_p12 = pnand %p1943_p11, %p2089_p5  ;;  %p1951_p2 = por %p1950_p1, %p1949_p0 }
0x1662   : > { %p1945_p13 = pneg %p1944_p12 }
0x1664   : > { %p1952_p3 = pnand %p1951_p2, %p1945_p13 }
0x1680   : > { %1364 = vmax.xlane.f32.xlu1 %v2358_v40 }
0x1684   : > { %1370 = vmax.xlane.f32.xlu1 %v2361_v41 }
0x1693   : > { %v2365_v10 = vpop.xlane.xlu0 %1362 }
0x1694   : > { %v1378_v44 = vsub.f32 %v2345_v28, %v2365_v10 }
0x1696   : > { %v1386_v47 = vmul.f32 1.442695, %v1378_v44 }
0x1697   : > { %v2367_v17 = vpop.xlane.xlu0 %1366 }
0x1698   : > { %v1380_v48 = vsub.f32 %v2348_v39, %v2367_v17 }
0x169a   : > { %v1390_v54 = vmul.f32 1.442695, %v1380_v48 }
0x169b   : > { %v2371_v32 = vpop.xlane.xlu0 %1368 }
0x169c   : > { %v1381_v45 = vsub.f32 %v2351_v30, %v2371_v32 }
0x169e   : > { %v1392_v52 = vmul.f32 1.442695, %v1381_v45 }
0x169f   : > { %v2381_v49 = vpop.xlane.xlu0 %1372 }
0x16a0   : > { %v1383_v53 = vsub.f32 %v2354_v31, %v2381_v49 }
0x16a2   : > { %v1396_v56 = vmul.f32 1.442695, %v1383_v53 }
0x16ce   : > { %v1254_v21 = vpop.permute.xlu1 %1253 }
0x16cf   : > { %1764 = vmatmul.mubr.msk.f32.gmra.mrb[16].mxu0 %vm458_vm11, %v1254_v21 }
0x170d   : > { %v2369_v29 = vpop.xlane.xlu1 %1364 }
0x170e   : > { %v1379_v43 = vsub.f32 %v2358_v40, %v2369_v29 }
0x1710   : > { %v1388_v46 = vmul.f32 1.442695, %v1379_v43 }
0x1711   : > { %v2383_v51 = vpop.xlane.xlu1 %1370 }
0x1712   : > { %1910 = vpow2.f32 %v1388_v46  ;;  %v1382_v55 = vsub.f32 %v2361_v41, %v2383_v51 }
0x1713   : > { %1912 = vpow2.f32 %v1386_v47 }
0x1714   : > { %1914 = vpow2.f32 %v1392_v52  ;;  %v1394_v57 = vmul.f32 1.442695, %v1382_v55 }
0x1715   : > { %1916 = vpow2.f32 %v1390_v54 }
0x1716   : > { %1918 = vpow2.f32 %v1396_v56 }
0x1717   : > { %1920 = vpow2.f32 %v1394_v57 }
0x171c   : > { %v1911_v61 = vpop.eup %1910 }
0x171d   : > { %v1913_v50 = vpop.eup %1912 }
0x171e   : > { %v1915_v62 = vpop.eup %1914 }
0x171f   : > { %v1917_v63 = vpop.eup %1916 }
0x1720   : > { %v1919_v0 = vpop.eup %1918 }
0x1721   : > { %v1921_v1 = vpop.eup %1920 }
0x17a2   : > { %v1765_v59 = vpop.f32.mrb[16].mxu0 }
0x17a3   : > { %v2389_v58 = vadd.f32 %v1765_v59, %v1565_v42  ;;  %v1353_v23 = vpop.f32.mrb[17].mxu0 }
0x17a4   : > { %v2391_v60 = vadd.f32 %v1565_v42, %v1353_v23 }
0x17a5   : > { %1376 = vmax.xlane.f32.xlu0 %v2389_v58 }
0x17a6   : > { %1374 = vmax.xlane.f32.xlu1 %v2391_v60 }
0x17a9   : > { %1404 = vadd.xlane.f32.xlu0 %v1911_v61 }
0x17aa   : > { %1402 = vadd.xlane.f32.xlu1 %v1913_v50 }
0x17ad   : > { %1408 = vadd.xlane.f32.xlu0 %v1915_v62 }
0x17ae   : > { %1406 = vadd.xlane.f32.xlu1 %v1917_v63 }
0x17b1   : > { %1412 = vadd.xlane.f32.xlu0 %v1919_v0 }
0x17b2   : > { %1410 = vadd.xlane.f32.xlu1 %v1921_v1 }
0x1832   : > { %v2395_v2 = vpop.xlane.xlu0 %1376 }
0x1833   : > { %v1385_v3 = vsub.f32 %v2389_v58, %v2395_v2  ;;  %v2399_v38 = vpop.xlane.xlu1 %1374 }
0x1834   : > { %v1384_v4 = vsub.f32 %v2391_v60, %v2399_v38 }
0x1835   : > { %v1400_v5 = vmul.f32 1.442695, %v1385_v3 }
0x1836   : > { %v1398_v6 = vmul.f32 1.442695, %v1384_v4  ;;  %v1405_v7 = vpop.xlane.xlu0 %1404 }
0x1837   : > { %1922 = vpow2.f32 %v1400_v5  ;;  %v1403_v8 = vpop.xlane.xlu1 %1402 }
0x1838   : > { %1924 = vpow2.f32 %v1398_v6 }
0x1839   : > { %1926 = vlog2.f32 %v1405_v7 }
0x183a   : > { %1928 = vlog2.f32 %v1403_v8  ;;  %v1409_v9 = vpop.xlane.xlu0 %1408 }
0x183b   : > { %1930 = vlog2.f32 %v1409_v9  ;;  %v1407_v11 = vpop.xlane.xlu1 %1406 }
0x183c   : > { %1932 = vlog2.f32 %v1407_v11 }
0x183e   : > { %v1413_v13 = vpop.xlane.xlu0 %1412 }
0x183f   : > { %1934 = vlog2.f32 %v1413_v13  ;;  %v1411_v14 = vpop.xlane.xlu1 %1410 }
0x1840   : > { %1936 = vlog2.f32 %v1411_v14 }
0x1841   : > { %v1923_v15 = vpop.eup %1922 }
0x1842   : > { %v1925_v16 = vpop.eup %1924  ;;  %1416 = vadd.xlane.f32.xlu0 %v1923_v15 }
0x1843   : > { %v1927_v18 = vpop.eup %1926  ;;  %1414 = vadd.xlane.f32.xlu1 %v1925_v16 }
0x1844   : > { %v1929_v19 = vpop.eup %1928  ;;  %v1421_v20 = vmul.f32 0.6931472, %v1927_v18 }
0x1845   : > { %v1931_v33 = vpop.eup %1930  ;;  %v1419_v22 = vmul.f32 0.6931472, %v1929_v19 }
0x1846   : > { %v1933_v12 = vpop.eup %1932  ;;  %v1435_v24 = vadd.f32 %v1421_v20, %v2369_v29  ;;  %v1425_v25 = vmul.f32 0.6931472, %v1931_v33 }
0x1847   : > { %v1434_v26 = vadd.f32 %v1419_v22, %v2365_v10  ;;  %v1423_v35 = vmul.f32 0.6931472, %v1933_v12 }
0x1848   : > { %v1443_v36 = vsub.f32 %v2358_v40, %v1435_v24  ;;  %v1437_v27 = vadd.f32 %v1425_v25, %v2371_v32 }
0x1849   : > { %v1935_v42 = vpop.eup %1934  ;;  %v1442_v34 = vsub.f32 %v2345_v28, %v1434_v26  ;;  %v1436_v37 = vadd.f32 %v1423_v35, %v2367_v17 }
0x184a   : > { %v1937_v21 = vpop.eup %1936  ;;  %1451 = vst [vmem:[%s2412_s12 + $0x8] sm:$0xff] %v1443_v36  ;;  %v1445_v10 = vsub.f32 %v2351_v30, %v1437_v27  ;;  %v1429_v40 = vmul.f32 0.6931472, %v1935_v42 }
0x184b   : > { %1450 = vst [vmem:[%s2412_s12] sm:$0xff] %v1442_v34  ;;  %v1444_v29 = vsub.f32 %v2348_v39, %v1436_v37  ;;  %v1427_v32 = vmul.f32 0.6931472, %v1937_v21 }
0x184c   : > { %1453 = vst [vmem:[%s2412_s12 + $0x18] sm:$0xff] %v1445_v10  ;;  %v1439_v28 = vadd.f32 %v1429_v40, %v2381_v49 }
0x184d   : > { %1452 = vst [vmem:[%s2412_s12 + $0x10] sm:$0xff] %v1444_v29  ;;  %v1438_v17 = vadd.f32 %v1427_v32, %v2383_v51 }
0x184e   : > { %v1447_v43 = vsub.f32 %v2354_v31, %v1439_v28 }
0x184f   : > { %v1446_v44 = vsub.f32 %v2361_v41, %v1438_v17 }
0x1850   : > { %1455 = vst [vmem:[%s2412_s12 + $0x28] sm:$0xff] %v1447_v43 }
0x1851   : > { %1454 = vst [vmem:[%s2412_s12 + $0x20] sm:$0xff] %v1446_v44 }
0x18cf   : > { %v1417_v30 = vpop.xlane.xlu0 %1416 }
0x18d0   : > { %1938 = vlog2.f32 %v1417_v30  ;;  %v1415_v39 = vpop.xlane.xlu1 %1414 }
0x18d1   : > { %1940 = vlog2.f32 %v1415_v39 }
0x18da   : > { %v1939_v45 = vpop.eup %1938 }
0x18db   : > { %v1941_v46 = vpop.eup %1940  ;;  %v1433_v47 = vmul.f32 0.6931472, %v1939_v45 }
0x18dc   : > { %v1431_v48 = vmul.f32 0.6931472, %v1941_v46 }
0x18dd   : > { %v1441_v31 = vadd.f32 %v1433_v47, %v2395_v2 }
0x18de   : > { %v1440_v41 = vadd.f32 %v1431_v48, %v2399_v38 }
0x18df   : > { %v1449_v49 = vsub.f32 %v2389_v58, %v1441_v31 }
0x18e0   : > { %v1448_v51 = vsub.f32 %v2391_v60, %v1440_v41 }
0x18e1   : > { %1457 = vst [vmem:[%s2412_s12 + $0x38] sm:$0xff] %v1449_v49 }
0x18e2   : > { %1456 = vst [vmem:[%s2412_s12 + $0x30] sm:$0xff] %v1448_v51 }
0x18e3   : > { %1955 = shalt.err (!%p1952_p3)
}
0x18e4   : > { %s1956_s28 = scalar_lea.hbm %s2434_s17, 1024  ;;  %s1960_s10 = scalar_lea.hbm %s2490_s6, 2048 }
0x18e5   : > { %p1957_p4 = scmp.ne.s32.totalorder %s2434_s17, %s1956_s28  ;;  %p1961_p9 = scmp.lt.u32.totalorder %s2434_s17, %s2490_s6 }
0x18e6   : > { %p1962_p10 = scmp.lt.u32.totalorder %s1960_s10, %s1956_s28  ;;  %p1964_p12 = scmp.lt.u32.totalorder %s1956_s28, %s2434_s17 }
0x18e7   : > { %p1958_p7 = pnand %p1957_p4, %p2089_p5 }
0x18e8   : > { %p1963_p11 = por %p1962_p10, %p1961_p9 }
0x18e9   : > { %p1959_p8 = pneg %p1958_p7 }
0x18ea   : > { %p1965_p13 = por %p1964_p12, %p1963_p11 }
0x18ec   : > { %p1966_p0 = pnand %p1965_p13, %p1959_p8 }
0x18ee   : > { %1969 = shalt.err (!%p1966_p0)
}
0x18ef   : > { %s2014_s14 = smov 128   ;;  %s2015_s13 = smov 8  }
0x18f0   : > { %1828 = dma.vmem_to_hbm [thread:$0]  (%p2089_p5), %s2436_s15, 1024, %s2434_s17, %s2443_s25, %s2014_s14, %s2014_s14, %s2015_s13  }
0x18f1 PF: > { %p1834_p1 = scmp.ge.s32.totalorder %s2004_s24, 2  ;;  %s1487_s16 = sand.u32 1, %s1992_s21  }
0x18f2   : > { %s1488_s18 = scalar_lea.sflag [#allocation3], %s1487_s16 }
0x18f3   : > { %p1831_p2 = pnand %p1834_p1, %p2093_p6 }
0x18f5   : > { %1987 = dma.done.wait (!%p1831_p2), %s1488_s18, 1024  }
0x18f6   : > { %1989 = vsyncadd (!%p1831_p2), %s1488_s18, 4294966272  ;;  %p16_p3 = scmp.ge.s32.totalorder %s2076_s27, 4   ;;  %s2495_s21 = smov %s1996_s22 }
0x18f7   : > { %s2496_s22 = smov %s2000_s23  ;;  %s2497_s23 = smov %s2087_s30 }
0x18f8   : > { %s2498_s24 = smov %s2076_s27  ;;  %18 = sbr.rel (!%p16_p3) target bundleno = 3 (0x3), region = 79 }
0x18ff   :  { %1493 = vsyncpa [#allocation3], 1 }
0x1900   :  { %1495 = vsyncpa [#allocation3 + $0x1], 1 }

</bundles_post_ra>
